<compile_context>
chip_gen: v6e
topology: v6e:2x2x1
jax: 0.10.0
libtpu: 0.0.40
codegen_flags: <defaults>
</compile_context>

<pallas_src>
import math

import jax
import jax.numpy as jnp
from jax import lax
from jax.experimental import pallas as pl
from jax.experimental.pallas import tpu as pltpu

_EPS = 1e-6


# ----------------------------------------------------------------------------
# Per-generation sizing policy
# ----------------------------------------------------------------------------
def _chip_config():
    """VMEM budget / block sizing per TPU generation (v5e/v6e vs v7x)."""
    vmem = None
    try:
        vmem = int(getattr(pltpu.get_tpu_info(), "vmem_capacity_bytes", 0)) or None
    except Exception:
        vmem = None
    if vmem is None:
        try:
            kind = jax.devices()[0].device_kind.lower()
        except Exception:
            kind = ""
        is_v7 = ("v7" in kind) or ("7x" in kind)
        vmem = 64 * 2**20 if is_v7 else 128 * 2**20

    if vmem <= 96 * 2**20:
        # v7x-class: 64 MiB VMEM per TensorCore, 2 TensorCores per chip.
        return {
            "vmem_limit": 48 * 2**20,
            "block_bytes": 8 * 2**20,        # larger blocks: 0.35us step overhead
            "single_pass_max": 8 * 2**20,    # 4x block (in+out dbl-buffered) fits
            "multi_tc": True,
        }
    # v5e / v6e: 128 MiB physical VMEM, 1 TensorCore per chip.
    return {
        "vmem_limit": 96 * 2**20,
        "block_bytes": 4 * 2**20,
        "single_pass_max": 16 * 2**20,       # avoid 1.5x-traffic two-pass path
        "multi_tc": False,
    }


def _pick_chunk(rows, kc):
    """Row-chunk size so the f32 working set per chunk stays ~512 KiB."""
    target = max(8, (512 * 1024) // (kc * 4))
    chunk = (min(rows, target) // 8) * 8
    if chunk < 8:
        chunk = rows
    return min(chunk, rows)


def _pick_tile(rows, target):
    """Pick an HW row tile; prefer a multiple-of-8 divisor of `rows` so no
    OOB mask is needed; otherwise use the target and mask only the last tile."""
    if rows <= target:
        return rows, False
    target = max(8, (target // 8) * 8)
    best = 0
    d = target
    while d >= 8:
        if rows % d == 0:
            best = d
            break
        d -= 8
    if best >= max(8, target // 2):
        return best, False
    return target, (rows % target != 0)


# ----------------------------------------------------------------------------
# In-kernel helpers (trace-time)
# ----------------------------------------------------------------------------
def _chunked_ssq(x_ref, chunk, *, row0=None, row_limit=None):
    """Per-(batch, lane) f32 sum of squares over the row axis of a (bn, R, kc)
    ref, processed `chunk` rows at a time so no block-sized f32 temporary is
    materialized.  If row0/row_limit are given, global rows >= row_limit are
    zeroed *before* squaring (so OOB garbage / NaNs cannot leak in)."""
    bn, R, kc = x_ref.shape
    nfull = R // chunk
    rem = R - nfull * chunk

    def ssq_of(xs, g0, size):
        xf = xs.astype(jnp.float32)
        if row_limit is not None:
            r = g0 + lax.broadcasted_iota(jnp.int32, (1, size, 1), 1)
            xf = jnp.where(r < row_limit, xf, 0.0)
        return jnp.sum(xf * xf, axis=1)                    # (bn, kc) f32

    base = 0 if row0 is None else row0
    if nfull == 1 and rem == 0:
        return ssq_of(x_ref[...], base, R)

    acc = jnp.zeros((bn, kc), jnp.float32)
    if nfull > 0:
        def body(i, a):
            s0 = pl.multiple_of(i * chunk, chunk)
            return a + ssq_of(x_ref[:, pl.ds(s0, chunk), :], base + s0, chunk)
        acc = lax.fori_loop(0, nfull, body, acc)
    if rem > 0:
        s0 = nfull * chunk
        acc = acc + ssq_of(x_ref[:, pl.ds(s0, rem), :], base + s0, rem)
    return acc


def _apply_epilogue(x_ref, o_ref, nx, gamma, beta, chunk):
    """o = gamma*(x*nx) + beta + x, written in row chunks (bounds VMEM temps).

    Runs in the input dtype (bf16 stays bf16, matching in-dtype math).
    TODO(synk): on v5e (no bf16 VALU) consider f32 epilogue math + cast at store.
    """
    bn, R, kc = x_ref.shape
    nfull = R // chunk
    rem = R - nfull * chunk

    if nfull == 1 and rem == 0:
        x = x_ref[...]
        o_ref[...] = gamma * (x * nx) + beta + x
        return

    def write(s0, size):
        xs = x_ref[:, pl.ds(s0, size), :]
        o_ref[:, pl.ds(s0, size), :] = gamma * (xs * nx) + beta + xs

    if nfull > 0:
        @pl.loop(0, nfull)
        def _(i):
            write(pl.multiple_of(i * chunk, chunk), chunk)
    if rem > 0:
        write(nfull * chunk, rem)


# ----------------------------------------------------------------------------
# Kernels
# ----------------------------------------------------------------------------
def _make_fused_kernel(k, c, chunk):
    """Single-pass kernel: block = (bn, HW/k, k*C) covering whole batch elems."""
    kc = k * c

    def kernel(x_ref, gamma_ref, beta_ref, o_ref):
        bn = x_ref.shape[0]
        dt = x_ref.dtype

        # Per-channel sum of squares (f32, chunked over rows).
        ssq = _chunked_ssq(x_ref, chunk)                      # (bn, kc)
        ssq_c = jnp.sum(ssq.reshape(bn, k, c), axis=1)        # (bn, c) fold lanes

        gx = jnp.sqrt(ssq_c)
        nx = gx / (jnp.mean(gx, axis=-1, keepdims=True) + _EPS)
        nx = jnp.tile(nx, (1, k)).reshape(bn, 1, kc).astype(dt)   # folded lanes

        gamma = gamma_ref[...].astype(dt)                     # (1, kc), pre-tiled
        beta = beta_ref[...].astype(dt)
        _apply_epilogue(x_ref, o_ref, nx, gamma, beta, chunk)

    return kernel


def _make_reduce_kernel(k, c, rows_total, t, chunk, need_mask):
    """Two-pass, pass 1: per-tile partial sum of squares (fully parallel grid;
    no accumulator -> both v7x TensorCores stay busy even for batch 1)."""
    kc = k * c

    def kernel(x_ref, ssq_ref):
        bn = x_ref.shape[0]
        j = pl.program_id(1)

        def emit(acc):
            ssq_ref[...] = acc.reshape(bn, 1, 1, kc)

        if need_mask:
            last = pl.num_programs(1) - 1

            @pl.when(j < last)                    # bulk tiles: no mask overhead
            def _():
                emit(_chunked_ssq(x_ref, chunk))

            @pl.when(j == last)                   # only the last tile masks OOB
            def _():
                emit(_chunked_ssq(x_ref, chunk, row0=j * t, row_limit=rows_total))
        else:
            emit(_chunked_ssq(x_ref, chunk))

    return kernel


def _make_apply_kernel(chunk):
    """Two-pass, pass 2: fused elementwise epilogue over HW tiles."""

    def kernel(x_ref, nx_ref, gamma_ref, beta_ref, o_ref):
        dt = x_ref.dtype
        nx = nx_ref[...].astype(dt)               # (bn, 1, kc), pre-tiled
        gamma = gamma_ref[...].astype(dt)         # (1, kc), pre-tiled
        beta = beta_ref[...].astype(dt)
        _apply_epilogue(x_ref, o_ref, nx, gamma, beta, chunk)

    return kernel


# ----------------------------------------------------------------------------
# Wrapper
# ----------------------------------------------------------------------------
def global_response_norm(x, gamma, beta, *,
                         block_bytes=None,
                         single_pass_max_bytes=None,
                         hw_tile=None,
                         force_two_pass=False):
    """x: (N, H, W, C); gamma, beta: (1, 1, 1, C).  Returns (N, H, W, C)."""
    n, h, w, c = x.shape
    hw = h * w
    itemsize = x.dtype.itemsize

    cfg = _chip_config()
    if block_bytes is None:
        block_bytes = cfg["block_bytes"]
    if single_pass_max_bytes is None:
        single_pass_max_bytes = cfg["single_pass_max"]
    vmem_limit = cfg["vmem_limit"]
    multi_tc = cfg["multi_tc"]

    # Lane-folding factor: fold k spatial rows into lanes so the last dim is a
    # multiple of 128 (free, contiguous reshape -- no HBM transpose/pad).
    k = 128 // math.gcd(c, 128)
    if hw % k != 0:
        # TODO(synk): bulk+tail folding for narrow C with HW not divisible by
        # k; this fallback keeps last dim = C (<128) -> masked partial stores.
        k = 1
    rows = hw // k
    kc = k * c

    x3 = x.reshape(n, rows, kc)
    # Pre-tile gamma/beta to the folded lane layout ONCE (tiny HBM arrays);
    # the kernels then just read them, no per-step XLU tiling.
    g2 = jnp.tile(jnp.reshape(gamma, (1, c)), (1, k))
    b2 = jnp.tile(jnp.reshape(beta, (1, c)), (1, k))

    per_batch_bytes = hw * c * itemsize

    if (not force_two_pass) and per_batch_bytes <= single_pass_max_bytes:
        # ---------------- single-pass fused path (reads x once) -------------
        bn = max(1, min(n, block_bytes // max(per_batch_bytes, 1)))
        if multi_tc and n >= 2:
            bn = min(bn, (n + 1) // 2)       # keep >= 2 grid steps for 2 TCs (v7x)
        nb = pl.cdiv(n, bn)
        chunk = _pick_chunk(rows, kc)

        y3 = pl.pallas_call(
            _make_fused_kernel(k, c, chunk),
            out_shape=jax.ShapeDtypeStruct((n, rows, kc), x.dtype),
            grid=(nb,),
            in_specs=[
                pl.BlockSpec((bn, rows, kc), lambda i: (i, 0, 0)),
                pl.BlockSpec((1, kc), lambda i: (0, 0)),
                pl.BlockSpec((1, kc), lambda i: (0, 0)),
            ],
            out_specs=pl.BlockSpec((bn, rows, kc), lambda i: (i, 0, 0)),
            compiler_params=pltpu.CompilerParams(
                dimension_semantics=("parallel",),
                vmem_limit_bytes=vmem_limit),
        )(x3, g2, b2)
        return y3.reshape(n, h, w, c)

    # ---------------- two-pass HW-tiled path (large per-batch slabs) --------
    bn = 1
    if hw_tile is not None:
        t = min(int(hw_tile), rows)
        if t < rows:
            t = max(8, (t // 8) * 8)         # (8,128) block constraint
        need_mask = (rows % t) != 0
    else:
        target = max(8, block_bytes // (kc * itemsize))
        t, need_mask = _pick_tile(rows, target)
    nt = pl.cdiv(rows, t)
    chunk = _pick_chunk(t, kc)

    # Pass 1: per-(batch, tile) partial sum of squares; fully parallel grid.
    ssq_parts = pl.pallas_call(
        _make_reduce_kernel(k, c, rows, t, chunk, need_mask),
        out_shape=jax.ShapeDtypeStruct((n, nt, 1, kc), jnp.float32),
        grid=(n, nt),
        in_specs=[pl.BlockSpec((bn, t, kc), lambda i, j: (i, j, 0))],
        out_specs=pl.BlockSpec((bn, 1, 1, kc), lambda i, j: (i, j, 0, 0)),
        compiler_params=pltpu.CompilerParams(
            dimension_semantics=("parallel", "parallel"),
            vmem_limit_bytes=vmem_limit),
    )(x3)

    # Tiny Nx finalize in plain JAX (arrays are (N, C)-sized; negligible).
    ssq = jnp.sum(ssq_parts, axis=(1, 2))                  # (n, kc)
    ssq_c = jnp.sum(ssq.reshape(n, k, c), axis=1)          # (n, c)
    gx = jnp.sqrt(ssq_c)
    nx = gx / (jnp.mean(gx, axis=-1, keepdims=True) + _EPS)
    nx3 = jnp.tile(nx, (1, k)).reshape(n, 1, kc)           # f32, folded lanes

    # Pass 2: fused elementwise epilogue, fully parallel grid.
    y3 = pl.pallas_call(
        _make_apply_kernel(chunk),
        out_shape=jax.ShapeDtypeStruct((n, rows, kc), x.dtype),
        grid=(n, nt),
        in_specs=[
            pl.BlockSpec((bn, t, kc), lambda i, j: (i, j, 0)),
            pl.BlockSpec((bn, 1, kc), lambda i, j: (i, 0, 0)),
            pl.BlockSpec((1, kc), lambda i, j: (0, 0)),
            pl.BlockSpec((1, kc), lambda i, j: (0, 0)),
        ],
        out_specs=pl.BlockSpec((bn, t, kc), lambda i, j: (i, j, 0)),
        compiler_params=pltpu.CompilerParams(
            dimension_semantics=("parallel", "parallel"),
            vmem_limit_bytes=vmem_limit),
    )(x3, nx3, g2, b2)
    return y3.reshape(n, h, w, c)


# ----------------------------------------------------------------------------
# Reference & test
# ----------------------------------------------------------------------------
def _reference(x, gamma, beta):
    xf = x.astype(jnp.float32)
    gx = jnp.sqrt(jnp.sum(xf * xf, axis=(1, 2), keepdims=True))
    nx = gx / (jnp.mean(gx, axis=-1, keepdims=True) + 1e-6)
    return (gamma * (xf * nx) + beta + xf).astype(x.dtype)


if __name__ == "__main__":
    key = jax.random.PRNGKey(0)
    kx, kg, kb = jax.random.split(key, 3)

    N, H, W, C = 2, 16, 16, 32  # small NHWC test shape; dim = C = 32

    x = jax.random.normal(kx, (N, H, W, C), dtype=jnp.float32)
    # Module __init__ uses zeros for gamma/beta; use small non-zero values so
    # the full compute path is exercised.
    gamma = 0.1 * jax.random.normal(kg, (1, 1, 1, C), dtype=jnp.float32)
    beta = 0.1 * jax.random.normal(kb, (1, 1, 1, C), dtype=jnp.float32)

    ref = _reference(x, gamma, beta)

    # 1) default fused single-pass path
    out = jax.block_until_ready(global_response_norm(x, gamma, beta))
    assert out.shape == ref.shape and out.dtype == ref.dtype
    assert jnp.allclose(out, ref, atol=1e-5, rtol=1e-5), "single-pass mismatch"

    # 2) two-pass path, HW tile divides the (folded) spatial extent (no mask)
    out2 = jax.block_until_ready(
        global_response_norm(x, gamma, beta, force_two_pass=True, hw_tile=16))
    assert jnp.allclose(out2, ref, atol=1e-5, rtol=1e-5), "two-pass mismatch"

    # 3) two-pass path with a non-dividing tile (exercises last-tile-only mask)
    out3 = jax.block_until_ready(
        global_response_norm(x, gamma, beta, force_two_pass=True, hw_tile=24))
    assert jnp.allclose(out3, ref, atol=1e-5, rtol=1e-5), "masked two-pass mismatch"

    # 4) bf16: reduction/Nx stay f32, epilogue runs in-dtype -> looser tolerance.
    xb = x.astype(jnp.bfloat16)
    refb = _reference(xb, gamma, beta)
    outb = jax.block_until_ready(global_response_norm(xb, gamma, beta))
    assert outb.dtype == jnp.bfloat16
    assert jnp.allclose(outb.astype(jnp.float32), refb.astype(jnp.float32),
                        atol=1e-1, rtol=5e-2), "bf16 mismatch"

    print("KERNEL_OK")
</pallas_src>

<mosaic_0001>
module attributes {stable_mosaic.version = 11 : i64} {
  func.func @kernel(%arg0: i32, %arg1: memref<2x64x128xf32, #tpu.memory_space<vmem>>, %arg2: memref<1x128xf32, #tpu.memory_space<vmem>>, %arg3: memref<1x128xf32, #tpu.memory_space<vmem>>, %arg4: memref<2x64x128xf32, #tpu.memory_space<vmem>>) attributes {dimension_semantics = [#tpu.dimension_semantics<parallel>], iteration_bounds = array<i64: 1>, scalar_prefetch = 0 : i64, scratch_operands = 0 : i64, tpu.core_type = #tpu.core_type<tc>, window_params = [{transform_indices = @transform_0, window_bounds = array<i64: 2, 64, 128>}, {pipeline_mode = #tpu.pipeline_mode<synchronous>, transform_indices = @transform_1, window_bounds = array<i64: 1, 128>}, {pipeline_mode = #tpu.pipeline_mode<synchronous>, transform_indices = @transform_2, window_bounds = array<i64: 1, 128>}, {transform_indices = @transform_3, window_bounds = array<i64: 2, 64, 128>}]} {
    %c0 = arith.constant 0 : index
    %c0_0 = arith.constant 0 : index
    %c0_1 = arith.constant 0 : index
    %0 = vector.load %arg1[%c0, %c0_0, %c0_1] : memref<2x64x128xf32, #tpu.memory_space<vmem>>, vector<2x64x128xf32>
    %1 = arith.mulf %0, %0 : vector<2x64x128xf32>
    %cst = arith.constant dense<0.000000e+00> : vector<2x128xf32>
    %2 = vector.multi_reduction <add>, %1, %cst [1] : vector<2x64x128xf32> to vector<2x128xf32>
    %3 = vector.shape_cast %2 : vector<2x128xf32> to vector<2x4x32xf32>
    %cst_2 = arith.constant dense<0.000000e+00> : vector<2x32xf32>
    %4 = vector.multi_reduction <add>, %3, %cst_2 [1] : vector<2x4x32xf32> to vector<2x32xf32>
    %5 = math.sqrt %4 : vector<2x32xf32>
    %cst_3 = arith.constant dense<0.000000e+00> : vector<2xf32>
    %6 = vector.multi_reduction <add>, %5, %cst_3 [1] : vector<2x32xf32> to vector<2xf32>
    %7 = vector.shape_cast %6 : vector<2xf32> to vector<2x1xf32>
    %cst_4 = arith.constant 3.200000e+01 : f32
    %8 = vector.broadcast %cst_4 : f32 to vector<2x1xf32>
    %9 = arith.divf %7, %8 : vector<2x1xf32>
    %cst_5 = arith.constant 9.99999997E-7 : f32
    %10 = vector.broadcast %cst_5 : f32 to vector<2x1xf32>
    %11 = arith.addf %9, %10 : vector<2x1xf32>
    %12 = vector.broadcast %11 : vector<2x1xf32> to vector<2x32xf32>
    %13 = arith.divf %5, %12 : vector<2x32xf32>
    %14 = tpu.concatenate %13, %13, %13, %13 in 1 : vector<2x32xf32>, vector<2x32xf32>, vector<2x32xf32>, vector<2x32xf32> -> vector<2x128xf32>
    %15 = vector.shape_cast %14 : vector<2x128xf32> to vector<2x1x128xf32>
    %c0_6 = arith.constant 0 : index
    %c0_7 = arith.constant 0 : index
    %16 = vector.load %arg2[%c0_6, %c0_7] : memref<1x128xf32, #tpu.memory_space<vmem>>, vector<1x128xf32>
    %c0_8 = arith.constant 0 : index
    %c0_9 = arith.constant 0 : index
    %17 = vector.load %arg3[%c0_8, %c0_9] : memref<1x128xf32, #tpu.memory_space<vmem>>, vector<1x128xf32>
    %c0_10 = arith.constant 0 : index
    %c0_11 = arith.constant 0 : index
    %c0_12 = arith.constant 0 : index
    %18 = vector.load %arg1[%c0_10, %c0_11, %c0_12] : memref<2x64x128xf32, #tpu.memory_space<vmem>>, vector<2x64x128xf32>
    %19 = vector.broadcast %15 : vector<2x1x128xf32> to vector<2x64x128xf32>
    %20 = arith.mulf %18, %19 : vector<2x64x128xf32>
    %21 = vector.shape_cast %16 : vector<1x128xf32> to vector<1x1x128xf32>
    %22 = vector.broadcast %21 : vector<1x1x128xf32> to vector<2x64x128xf32>
    %23 = arith.mulf %22, %20 : vector<2x64x128xf32>
    %24 = vector.shape_cast %17 : vector<1x128xf32> to vector<1x1x128xf32>
    %25 = vector.broadcast %24 : vector<1x1x128xf32> to vector<2x64x128xf32>
    %26 = arith.addf %23, %25 : vector<2x64x128xf32>
    %27 = arith.addf %26, %18 : vector<2x64x128xf32>
    %c0_13 = arith.constant 0 : index
    %c0_14 = arith.constant 0 : index
    %c0_15 = arith.constant 0 : index
    %28 = vector.load %arg4[%c0_13, %c0_14, %c0_15] : memref<2x64x128xf32, #tpu.memory_space<vmem>>, vector<2x64x128xf32>
    tpu.vector_store %arg4[%c0_13, %c0_14, %c0_15], %27 {strides = array<i32>} : memref<2x64x128xf32, #tpu.memory_space<vmem>>, vector<2x64x128xf32>,
    return
  }
  func.func @transform_0(%arg0: i32) -> (i32, i32, i32) {
    %c0_i32 = arith.constant 0 : i32
    %c0_i32_0 = arith.constant 0 : i32
    %c0_i32_1 = arith.constant 0 : i32
    return %arg0, %c0_i32, %c0_i32_0 : i32, i32, i32
  }
  func.func @transform_1(%arg0: i32) -> (i32, i32) {
    %c0_i32 = arith.constant 0 : i32
    %c0_i32_0 = arith.constant 0 : i32
    %c0_i32_1 = arith.constant 0 : i32
    return %c0_i32, %c0_i32_0 : i32, i32
  }
  func.func @transform_2(%arg0: i32) -> (i32, i32) {
    %c0_i32 = arith.constant 0 : i32
    %c0_i32_0 = arith.constant 0 : i32
    %c0_i32_1 = arith.constant 0 : i32
    return %c0_i32, %c0_i32_0 : i32, i32
  }
  func.func @transform_3(%arg0: i32) -> (i32, i32, i32) {
    %c0_i32 = arith.constant 0 : i32
    %c0_i32_0 = arith.constant 0 : i32
    %c0_i32_1 = arith.constant 0 : i32
    return %arg0, %c0_i32, %c0_i32_0 : i32, i32, i32
  }
}

</mosaic_0001>

<bundles_post_ra>
// kernel: tpu_custom_call.1
= control target key start
LH: loop header
LB: loop body
LE: loop exit
PB: predicated region body
PF: predicated region fallthrough
CT: control target
= control target key end

     0   :  { %8 = vsyncpa [#allocation3], 0  ;;  %s582_s0 = inlined_call_operand.hbm [shape: f32[2,64,128], index: 0, kind: input, shape index: {}]   ;;  %s583_s1 = inlined_call_operand.vmem [shape: f32[1,128], index: 1, kind: input, shape index: {}]   ;;  %s584_s2 = inlined_call_operand.vmem [shape: f32[1,128], index: 2, kind: input, shape index: {}]   ;;  %s585_s3 = inlined_call_operand.hbm [shape: f32[2,64,128], index: 3, kind: output, shape index: {}]  }
   0x1   :  { %9 = vsyncpa [#allocation4], 0  ;;  %s416_s12 = smov [#allocation2]  }
   0x2   :  { %s15_s13 = sshll.u32 %s416_s12, 4  ;;  %s16_s13 = int_to_ptr.vmem [resolvable:$true] %s15_s13 }
   0x3   :  { %s380_s14 = scalar_lea.vmem %s16_s13, 2048  ;;  %p385_p1 = scmp.lt.s32.totalorder %s16_s13, %s16_s13 }
   0x4   :  { %p381_p0 = scmp.ne.s32.totalorder %s16_s13, %s380_s14  ;;  %p386_p2 = scmp.lt.s32.totalorder %s380_s14, %s380_s14 }
   0x6   :  { %p387_p3 = por %p386_p2, %p385_p1 }
   0x8   :  { %p388_p4 = pnand %p387_p3, %p381_p0 }
   0xa   :  { %391 = shalt.err (!%p388_p4)
}
   0xb   :  { %s417_s15 = smov 128   ;;  %s418_s16 = smov 8  }
   0xc   :  { %21 = dma.hbm_to_vmem [thread:$0]  %s582_s0, 2048, %s16_s13, [#allocation3], %s417_s15, %s417_s15, %s418_s16  }
   0xd   :  { %412 = dma.done.wait [#allocation3], 2048  }
   0xe   :  { %413 = vsyncadd [#allocation3], 4294965248  ;;  %v453_v0 = vld [vmem:[#allocation2 + $0x40] sm:$0xff]  ;;  %v455_v1 = vld [vmem:[#allocation2 + $0x48] sm:$0xff]  ;;  %s419_s0 = smov 32   ;;  %s420_s19 = smov 96  }
   0xf   :  { %v457_v2 = vld [vmem:[#allocation2 + $0x50] sm:$0xff]  ;;  %v459_v3 = vld [vmem:[#allocation2 + $0x58] sm:$0xff]  ;;  %v53_v4 = vmul.f32 %v453_v0, %v453_v0  ;;  %v54_v5 = vmul.f32 %v455_v1, %v455_v1  ;;  %v467_v7 = vld [vmem:[#allocation2 + $0x60] sm:$0xff]  ;;  %vm102_vm0 = vcmask 1041409   ;;  %s421_s20 = smov 64   ;;  %vm139_vm1 = vcmask 257024  }
  0x10   :  { %v55_v6 = vmul.f32 %v457_v2, %v457_v2  ;;  %v469_v8 = vld [vmem:[#allocation2] sm:$0xff]  ;;  %v56_v9 = vmul.f32 %v459_v3, %v459_v3  ;;  %v473_v11 = vld [vmem:[#allocation2 + $0x8] sm:$0xff]  ;;  %v475_v12 = vld [vmem:[#allocation2 + $0x10] sm:$0xff]  ;;  %v57_v18 = vmul.f32 %v467_v7, %v467_v7  ;;  %v422_v62 = vmov 1983009808  }
  0x11   :  { %v74_v10 = vadd.f32 %v54_v5, %v53_v4  ;;  %v477_v13 = vld [vmem:[#allocation2 + $0x18] sm:$0xff]  ;;  %v45_v14 = vmul.f32 %v469_v8, %v469_v8  ;;  %v481_v15 = vld [vmem:[#allocation2 + $0x68] sm:$0xff]  ;;  %v46_v16 = vmul.f32 %v473_v11, %v473_v11  ;;  %v47_v17 = vmul.f32 %v475_v12, %v475_v12  ;;  %v489_v20 = vld [vmem:[#allocation2 + $0x20] sm:$0xff] }
  0x12   :  { %v491_v21 = vld [vmem:[#allocation2 + $0x70] sm:$0xff]  ;;  %v48_v22 = vmul.f32 %v477_v13, %v477_v13  ;;  %v58_v24 = vmul.f32 %v481_v15, %v481_v15  ;;  %v497_v26 = vld [vmem:[#allocation2 + $0x28] sm:$0xff]  ;;  %v499_v27 = vld [vmem:[#allocation2 + $0x78] sm:$0xff]  ;;  %v49_v28 = vmul.f32 %v489_v20, %v489_v20  ;;  %v116_v63 = vunpack.c.l.s4 %v422_v62 }
  0x13   :  { %v75_v19 = vadd.f32 %v74_v10, %v55_v6  ;;  %v61_v23 = vadd.f32 %v46_v16, %v45_v14  ;;  %v59_v30 = vmul.f32 %v491_v21, %v491_v21  ;;  %v505_v32 = vld [vmem:[#allocation2 + $0x30] sm:$0xff]  ;;  %v50_v33 = vmul.f32 %v497_v26, %v497_v26  ;;  %v511_v37 = vld [vmem:[#allocation2 + $0x38] sm:$0xff] }
  0x14   :  { %v60_v35 = vmul.f32 %v499_v27, %v499_v27  ;;  %v51_v38 = vmul.f32 %v505_v32, %v505_v32  ;;  %v52_v41 = vmul.f32 %v511_v37, %v511_v37  ;;  %v118_v4 = vlaneseq }
  0x15   :  { %v76_v25 = vadd.f32 %v75_v19, %v56_v9  ;;  %v62_v29 = vadd.f32 %v61_v23, %v47_v17  ;;  %v117_v9 = vunpack.c.0.s8 %v116_v63  ;;  %v423_v14 = vmov 1934713408  }
  0x16   :  { %v524_v10 = vshrl.u32 %v118_v4, 7  ;;  %v132_v16 = vunpack.c.l.s4 %v423_v14  ;;  %vm172_vm6 = vcmask 254976   ;;  %vm201_vm7 = vcmask 261120  }
  0x17   :  { %v77_v31 = vadd.f32 %v76_v25, %v57_v18  ;;  %v63_v34 = vadd.f32 %v62_v29, %v48_v22  ;;  %vm203_vm8 = vcmask 523264   ;;  %vm205_vm9 = vcmask 785408  }
  0x18   :  { %v120_v22 = vsub.s32 %v117_v9, %v524_v10 }
  0x19   :  { %v78_v36 = vadd.f32 %v77_v31, %v58_v24  ;;  %v64_v39 = vadd.f32 %v63_v34, %v49_v28  ;;  %v133_v24 = vunpack.c.0.s8 %v132_v16 }
  0x1b   :  { %v79_v40 = vadd.f32 %v78_v36, %v59_v30  ;;  %v65_v42 = vadd.f32 %v64_v39, %v50_v33 }
  0x1d   :  { %v80_v43 = vadd.f32 %v79_v40, %v60_v35  ;;  %v66_v44 = vadd.f32 %v65_v42, %v51_v38  ;;  %v136_v35 = vsub.s32 %v133_v24, %v524_v10  ;;  %v424_v40 = vmov 0.0  }
  0x1f   :  { %v81_v45 = vrot.slane %v80_v43, 4  ;;  %v67_v46 = vadd.f32 %v66_v44, %v52_v41 }
  0x21   :  { %v82_v47 = vadd.f32 %v81_v45, %v80_v43  ;;  %v68_v48 = vrot.slane %v67_v46, 4 }
  0x23   :  { %v83_v49 = vrot.slane %v82_v47, 2  ;;  %v69_v50 = vadd.f32 %v68_v48, %v67_v46 }
  0x25   :  { %v84_v51 = vadd.f32 %v83_v49, %v82_v47  ;;  %v70_v52 = vrot.slane %v69_v50, 2 }
  0x27   :  { %v85_v53 = vrot.slane %v84_v51, 1  ;;  %v71_v54 = vadd.f32 %v70_v52, %v69_v50 }
  0x29   :  { %v86_v55 = vadd.f32 %v85_v53, %v84_v51  ;;  %v72_v56 = vrot.slane %v71_v54, 1 }
  0x2b   :  { %99 = vrot.lane.b32.xlu1 %v86_v55, %s419_s0  ;;  %91 = vrot.lane.b32.xlu0 %v86_v55, %s420_s19  ;;  %v101_v57 = vrot.slane %v86_v55, 7  ;;  %v73_v58 = vadd.f32 %v72_v56, %v71_v54 }
  0x2d   :  { %v103_v59 = vsel %vm102_vm0, %v101_v57, %v73_v58 }
  0x2f   :  { %95 = vrot.lane.b32.xlu0 %v86_v55, %s421_s20  ;;  %89 = vrot.lane.b32.xlu1 %v73_v58, %s420_s19 }
  0x33   :  { %93 = vrot.lane.b32.xlu0 %v73_v58, %s421_s20  ;;  %97 = vrot.lane.b32.xlu1 %v73_v58, %s419_s0 }
  0x9d   :  { %v100_v60 = vpop.permute.xlu1 %99  ;;  %v92_v61 = vpop.permute.xlu0 %91 }
  0x9e   :  { %v108_v17 = vrot.slane %v100_v60, 7  ;;  %v104_v18 = vrot.slane %v92_v61, 7 }
  0xa1   :  { %v96_v5 = vpop.permute.xlu0 %95  ;;  %v90_v6 = vpop.permute.xlu1 %89 }
  0xa2   :  { %v106_v19 = vrot.slane %v96_v5, 7  ;;  %v105_v28 = vsel %vm102_vm0, %v104_v18, %v90_v6 }
  0xa5   :  { %v94_v23 = vpop.permute.xlu0 %93  ;;  %v98_v25 = vpop.permute.xlu1 %97 }
  0xa6   :  { %v107_v29 = vsel %vm102_vm0, %v106_v19, %v94_v23  ;;  %v109_v30 = vsel %vm102_vm0, %v108_v17, %v98_v25 }
  0xa7   :  { %v114_v31 = vcombine.low %v103_v59, %v107_v29  ;;  %v122_v33 = vcombine.low %v105_v28, %v109_v30  ;;  %v425_v29 = vmov 1966171168  }
  0xa8   :  { %v209_v30 = vunpack.c.l.s4 %v425_v29 }
  0xa9   :  { %v121_v34 = vrot.slane %v114_v31, %v120_v22  ;;  %v129_v36 = vrot.slane %v122_v33, %v120_v22 }
  0xaa   :  { %v210_v33 = vunpack.c.0.s8 %v209_v30 }
  0xab   :  { %v130_v38 = vcombine.low %v121_v34, %v129_v36 }
  0xad   :  { %v137_v39 = vrot.slane %v130_v38, %v136_v35  ;;  %v213_v35 = vsub.s32 %v210_v33, %v524_v10 }
  0xaf   :  { %v138_v41 = vcombine.high %v137_v39, %v424_v40  ;;  %v140_v42 = vsel %vm139_vm1, %v137_v39, 0.0 }
  0xb0   :  { %v141_v43 = vrot.slane %v140_v42, 4 }
  0xb1   :  { %v147_v44 = vsel %vm139_vm1, %v138_v41, 0.0  ;;  %v234_v41 = vsub.s32 0, %v524_v10 }
  0xb2   :  { %v142_v45 = vadd.f32 %v141_v43, %v140_v42  ;;  %v148_v46 = vrot.slane %v147_v44, 4 }
  0xb4   :  { %v143_v47 = vrot.slane %v142_v45, 2  ;;  %v149_v48 = vadd.f32 %v148_v46, %v147_v44 }
  0xb6   :  { %v144_v49 = vadd.f32 %v143_v47, %v142_v45  ;;  %v150_v50 = vrot.slane %v149_v48, 2 }
  0xb8   :  { %v145_v51 = vrot.slane %v144_v49, 1  ;;  %v151_v52 = vadd.f32 %v150_v50, %v149_v48 }
  0xba   :  { %v146_v53 = vadd.f32 %v145_v51, %v144_v49  ;;  %v152_v54 = vrot.slane %v151_v52, 1  ;;  %v351_v51 = vld [vmem:[%s583_s1] ss:$0 sm:$0xff] }
  0xbc   :  { %v153_v55 = vadd.f32 %v152_v54, %v151_v52  ;;  %364 = vrsqrt.f32 %v146_v53  ;;  %vm156_vm2 = vcmp.eq.f32.partialorder %v146_v53, inf  ;;  %v159_v61 = vand.u32 2147483648, %v146_v53 }
  0xbd   :  { %vm158_vm4 = vcmp.eq.f32.partialorder %v146_v53, 0.0 }
  0xbe   :  { %366 = vrsqrt.f32 %v153_v55  ;;  %vm163_vm3 = vcmp.eq.f32.partialorder %v153_v55, inf  ;;  %v166_v62 = vand.u32 2147483648, %v153_v55  ;;  %vm165_vm5 = vcmp.eq.f32.partialorder %v153_v55, 0.0 }
  0xc9   :  { %v365_v56 = vpop.eup %364 }
  0xca   :  { %v155_v57 = vmul.f32 %v365_v56, %v146_v53 }
  0xcb   :  { %v367_v58 = vpop.eup %366 }
  0xcc   :  { %v157_v59 = vsel %vm156_vm2, %v146_v53, %v155_v57  ;;  %v162_v60 = vmul.f32 %v367_v58, %v153_v55 }
  0xcd   :  { %v160_v4 = vsel %vm158_vm4, %v159_v61, %v157_v59 }
  0xce   :  { %v164_v63 = vsel %vm163_vm3, %v153_v55, %v162_v60 }
  0xcf   :  { %v167_v5 = vsel %vm165_vm5, %v166_v62, %v164_v63 }
  0xd0   :  { %v170_v6 = vsel %vm102_vm0, %v167_v5, %v160_v4 }
  0xd1   :  { %v173_v9 = vsel %vm172_vm6, %v170_v6, 0.0 }
  0xd2   :  { %174 = vadd.xlane.f32.xlu0 %v173_v9  ;;  %v352_v9 = vld [vmem:[%s584_s2] ss:$0 sm:$0xff]  ;;  %s426_s2 = smov [#allocation5]  }
  0xd3   :  { %s339_s24 = sshll.u32 %s426_s2, 4  ;;  %s340_s24 = int_to_ptr.vmem [resolvable:$true] %s339_s24 }
  0xd4   :  { %s392_s25 = scalar_lea.vmem %s340_s24, 2048  ;;  %p397_p6 = scmp.lt.s32.totalorder %s340_s24, %s340_s24 }
  0xd5   :  { %p393_p5 = scmp.ne.s32.totalorder %s340_s24, %s392_s25  ;;  %p398_p7 = scmp.lt.s32.totalorder %s392_s25, %s392_s25 }
  0xd7   :  { %p399_p8 = por %p398_p7, %p397_p6 }
  0xd9   :  { %p400_p9 = pnand %p399_p8, %p393_p5 }
 0x15b   :  { %v175_v14 = vpop.xlane.xlu0 %174 }
 0x15c   :  { %v177_v16 = vmul.f32 0.03125, %v175_v14 }
 0x15e   :  { %v178_v17 = vadd.f32 1e-06, %v177_v16 }
 0x160   :  { %v180_v18 = vrot.slane %v178_v17, 1  ;;  %368 = vrcp.f32 %v178_v17 }
 0x162   :  { %370 = vrcp.f32 %v180_v18 }
 0x16d   :  { %v369_v19 = vpop.eup %368 }
 0x16e   :  { %v184_v24 = vmul.f32 %v369_v19, %v160_v4 }
 0x16f   :  { %v371_v22 = vpop.eup %370 }
 0x170   :  { %v186_v23 = vmul.f32 %v371_v22, %v167_v5 }
 0x172   :  { %v189_v25 = vrot.slane %v186_v23, 7 }
 0x174   :  { %v190_v28 = vsel %vm102_vm0, %v189_v25, %v184_v24 }
 0x175   :  { %192 = vrot.lane.b32.xlu1 %v190_v28, %s419_s0 }
 0x179   :  { %195 = vrot.lane.b32.xlu1 %v190_v28, %s421_s20 }
 0x17d   :  { %198 = vrot.lane.b32.xlu1 %v190_v28, %s420_s19 }
 0x1e7   :  { %v193_v31 = vpop.permute.xlu1 %192 }
 0x1e8   :  { %v202_v36 = vsel %vm201_vm7, %v190_v28, %v193_v31 }
 0x1eb   :  { %v196_v34 = vpop.permute.xlu1 %195 }
 0x1ec   :  { %v204_v38 = vsel %vm203_vm8, %v202_v36, %v196_v34 }
 0x1ef   :  { %v199_v39 = vpop.permute.xlu1 %198 }
 0x1f0   :  { %v206_v40 = vsel %vm205_vm9, %v204_v38, %v199_v39 }
 0x1f1   :  { %v214_v42 = vrot.slane %v206_v40, %v213_v35 }
 0x1f3   :  { %v215_v43 = vcombine.high %v214_v42, %v214_v42  ;;  %v222_v44 = vrot.slane %v214_v42, %v213_v35 }
 0x1f5   :  { %v229_v45 = vrot.slane %v215_v43, %v213_v35  ;;  %v235_v46 = vrot.slane %v222_v44, %v234_v41 }
 0x1f7   :  { %v239_v47 = vrot.slane %v229_v45, %v234_v41  ;;  %v242_v48 = vmul.f32 %v235_v46, %v469_v8  ;;  %v243_v49 = vmul.f32 %v235_v46, %v473_v11  ;;  %v244_v50 = vmul.f32 %v235_v46, %v475_v12 }
 0x1f8   :  { %v245_v52 = vmul.f32 %v235_v46, %v477_v13  ;;  %v246_v10 = vmul.f32 %v235_v46, %v489_v20  ;;  %v247_v53 = vmul.f32 %v235_v46, %v497_v26  ;;  %v248_v54 = vmul.f32 %v235_v46, %v505_v32 }
 0x1f9   :  { %v249_v55 = vmul.f32 %v235_v46, %v511_v37  ;;  %v250_v56 = vmul.f32 %v239_v47, %v453_v0  ;;  %v251_v57 = vmul.f32 %v239_v47, %v455_v1  ;;  %v252_v58 = vmul.f32 %v239_v47, %v457_v2 }
 0x1fa   :  { %v253_v59 = vmul.f32 %v239_v47, %v459_v3  ;;  %v254_v60 = vmul.f32 %v239_v47, %v467_v7  ;;  %v255_v61 = vmul.f32 %v239_v47, %v481_v15  ;;  %v256_v62 = vmul.f32 %v239_v47, %v491_v21 }
 0x1fb   :  { %v257_v63 = vmul.f32 %v239_v47, %v499_v27  ;;  %v264_v4 = vmul.f32 %v351_v51, %v242_v48  ;;  %v265_v5 = vmul.f32 %v351_v51, %v243_v49  ;;  %v266_v6 = vmul.f32 %v351_v51, %v244_v50 }
 0x1fc   :  { %v267_v14 = vmul.f32 %v351_v51, %v245_v52  ;;  %v268_v16 = vmul.f32 %v351_v51, %v246_v10  ;;  %v269_v17 = vmul.f32 %v351_v51, %v247_v53  ;;  %v270_v18 = vmul.f32 %v351_v51, %v248_v54 }
 0x1fd   :  { %v271_v19 = vmul.f32 %v351_v51, %v249_v55  ;;  %v272_v22 = vmul.f32 %v351_v51, %v250_v56  ;;  %v273_v23 = vmul.f32 %v351_v51, %v251_v57  ;;  %v274_v24 = vmul.f32 %v351_v51, %v252_v58 }
 0x1fe   :  { %v275_v25 = vmul.f32 %v351_v51, %v253_v59  ;;  %v276_v28 = vmul.f32 %v351_v51, %v254_v60  ;;  %v277_v29 = vmul.f32 %v351_v51, %v255_v61  ;;  %v278_v30 = vmul.f32 %v351_v51, %v256_v62 }
 0x1ff   :  { %v279_v31 = vmul.f32 %v351_v51, %v257_v63  ;;  %v286_v33 = vadd.f32 %v352_v9, %v264_v4  ;;  %v287_v34 = vadd.f32 %v352_v9, %v265_v5  ;;  %v288_v35 = vadd.f32 %v352_v9, %v266_v6 }
 0x200   :  { %v289_v36 = vadd.f32 %v352_v9, %v267_v14  ;;  %v290_v38 = vadd.f32 %v352_v9, %v268_v16  ;;  %v291_v39 = vadd.f32 %v352_v9, %v269_v17  ;;  %v292_v40 = vadd.f32 %v352_v9, %v270_v18 }
 0x201   :  { %v293_v41 = vadd.f32 %v352_v9, %v271_v19  ;;  %v294_v42 = vadd.f32 %v352_v9, %v272_v22  ;;  %v295_v43 = vadd.f32 %v352_v9, %v273_v23  ;;  %v296_v44 = vadd.f32 %v352_v9, %v274_v24 }
 0x202   :  { %v297_v45 = vadd.f32 %v352_v9, %v275_v25  ;;  %v298_v46 = vadd.f32 %v352_v9, %v276_v28  ;;  %v299_v47 = vadd.f32 %v352_v9, %v277_v29  ;;  %v300_v48 = vadd.f32 %v352_v9, %v278_v30 }
 0x203   :  { %v301_v49 = vadd.f32 %v352_v9, %v279_v31  ;;  %v302_v50 = vadd.f32 %v286_v33, %v469_v8  ;;  %v303_v51 = vadd.f32 %v287_v34, %v473_v11  ;;  %v304_v52 = vadd.f32 %v288_v35, %v475_v12 }
 0x204   :  { %v305_v10 = vadd.f32 %v289_v36, %v477_v13  ;;  %v306_v53 = vadd.f32 %v290_v38, %v489_v20  ;;  %v307_v54 = vadd.f32 %v291_v39, %v497_v26  ;;  %v308_v55 = vadd.f32 %v292_v40, %v505_v32 }
 0x205   :  { %v309_v56 = vadd.f32 %v293_v41, %v511_v37  ;;  %v310_v57 = vadd.f32 %v294_v42, %v453_v0  ;;  %v311_v8 = vadd.f32 %v295_v43, %v455_v1  ;;  %v312_v11 = vadd.f32 %v296_v44, %v457_v2  ;;  %318 = vst [vmem:[#allocation5] sm:$0xff] %v302_v50 }
 0x206   :  { %319 = vst [vmem:[#allocation5 + $0x8] sm:$0xff] %v303_v51  ;;  %320 = vst [vmem:[#allocation5 + $0x10] sm:$0xff] %v304_v52  ;;  %v313_v12 = vadd.f32 %v297_v45, %v459_v3  ;;  %v314_v13 = vadd.f32 %v298_v46, %v467_v7  ;;  %v315_v20 = vadd.f32 %v299_v47, %v481_v15 }
 0x207   :  { %v316_v26 = vadd.f32 %v300_v48, %v491_v21  ;;  %321 = vst [vmem:[#allocation5 + $0x18] sm:$0xff] %v305_v10  ;;  %322 = vst [vmem:[#allocation5 + $0x20] sm:$0xff] %v306_v53  ;;  %v317_v0 = vadd.f32 %v301_v49, %v499_v27 }
 0x208   :  { %323 = vst [vmem:[#allocation5 + $0x28] sm:$0xff] %v307_v54  ;;  %324 = vst [vmem:[#allocation5 + $0x30] sm:$0xff] %v308_v55 }
 0x209   :  { %325 = vst [vmem:[#allocation5 + $0x38] sm:$0xff] %v309_v56  ;;  %326 = vst [vmem:[#allocation5 + $0x40] sm:$0xff] %v310_v57 }
 0x20a   :  { %327 = vst [vmem:[#allocation5 + $0x48] sm:$0xff] %v311_v8  ;;  %328 = vst [vmem:[#allocation5 + $0x50] sm:$0xff] %v312_v11 }
 0x20b   :  { %329 = vst [vmem:[#allocation5 + $0x58] sm:$0xff] %v313_v12  ;;  %330 = vst [vmem:[#allocation5 + $0x60] sm:$0xff] %v314_v13 }
 0x20c   :  { %331 = vst [vmem:[#allocation5 + $0x68] sm:$0xff] %v315_v20  ;;  %332 = vst [vmem:[#allocation5 + $0x70] sm:$0xff] %v316_v26 }
 0x20d   :  { %333 = vst [vmem:[#allocation5 + $0x78] sm:$0xff] %v317_v0 }
 0x20e   :  { %403 = shalt.err (!%p400_p9)
}
 0x20f   :  { %345 = dma.vmem_to_hbm [thread:$0]  %s340_s24, 2048, %s585_s3, [#allocation4], %s417_s15, %s417_s15, %s418_s16  }
 0x210   :  { %414 = dma.done.wait [#allocation4], 2048  }
 0x211   :  { %415 = vsyncadd [#allocation4], 4294965248 }
 0x212   :  { %349 = vsyncpa [#allocation3], 1 }
 0x213   :  { %350 = vsyncpa [#allocation4], 1 }

</bundles_post_ra>
